<compile_context>
chip_gen: v5e
topology: v5e:2x2
jax: 0.10.0
libtpu: 0.0.40
codegen_flags: <defaults>
</compile_context>

<pallas_src>
import jax
import jax.numpy as jnp
from jax.experimental import pallas as pl
from jax.experimental.pallas import tpu as pltpu


# ------------------------------- kernel ------------------------------------
def _avg_merge_kernel(x1_ref, x2_ref, o_ref):
    # (a + b) * 0.5 is bit-identical to (a + b) / 2 for IEEE floats (x0.5 is exact),
    # matching torch.stack(...).mean(dim=1) semantics for floating dtypes.
    a = x1_ref[...]
    b = x2_ref[...]
    o_ref[...] = ((a + b) * 0.5).astype(o_ref.dtype)


# ------------------------------ helpers -------------------------------------
def _round_up(x, m):
    return ((x + m - 1) // m) * m


def _is_v7x():
    # v7x has 64 MiB VMEM per TensorCore; v5e/v6e have 128 MiB.
    try:
        return int(pltpu.get_tpu_info().vmem_capacity_bytes) <= (64 << 20)
    except Exception:
        return False  # conservative: use the v5e/v6e-safe tiling


_LANE_CANDIDATES = (1024, 512, 256, 128)
_ROW_ALIGN = 32  # multiple of 8/16/32 -> safe for f32 / bf16 / 8-bit packed tiles


# ------------------------------- wrapper ------------------------------------
def avg_pool_merge(x1, x2):
    """Pallas implementation of AvgPoolMerge.forward(x1, x2)."""
    assert x1.shape == x2.shape, "AvgPoolMerge requires equal shapes"
    assert x1.dtype == x2.dtype, "AvgPoolMerge requires equal dtypes"
    dtype = x1.dtype
    # torch.mean raises on integer tensors, so float-only is the faithful contract.
    assert jnp.issubdtype(dtype, jnp.floating), "AvgPoolMerge kernel supports floating dtypes only"

    orig_shape = x1.shape
    n = int(x1.size)
    if n == 0:
        return ((x1 + x2) * 0.5).reshape(orig_shape)

    itemsize = jnp.dtype(dtype).itemsize

    # Lane width: largest multiple of 128 that divides n -> zero-copy fast path.
    lanes = None
    for cand in _LANE_CANDIDATES:
        if n % cand == 0:
            lanes = cand
            break
    if lanes is None:
        lanes = 512  # non-128-aligned n: pad the tail up to the next lane multiple

    rows_total = pl.cdiv(n, lanes)
    padded_n = rows_total * lanes
    needs_pad = padded_n != n

    # Per-operand block byte target (constant bytes across dtypes).
    block_bytes = (4 << 20) if _is_v7x() else (2 << 20)
    rows_for_bytes = max(
        _ROW_ALIGN, (block_bytes // (lanes * itemsize)) // _ROW_ALIGN * _ROW_ALIGN
    )

    if rows_total <= 2 * _ROW_ALIGN:
        # Tiny input: one block spanning the full row extent (block dim == array dim,
        # so the (8,128) divisibility rule is satisfied by equality).
        block_rows = rows_total
    else:
        # Cap so the grid has >= 2 steps (megacore sharding on v7x; negligible
        # extra per-step cost on single-core chips).
        cap2 = _round_up(pl.cdiv(rows_total, 2), _ROW_ALIGN)
        block_rows = min(rows_for_bytes, cap2)

    grid = (pl.cdiv(rows_total, block_rows),)

    def _prep(x):
        xf = x.reshape(-1)
        if needs_pad:
            xf = jnp.pad(xf, (0, padded_n - n))
        return xf.reshape(rows_total, lanes)

    a = _prep(x1)
    b = _prep(x2)

    spec = pl.BlockSpec((block_rows, lanes), lambda i: (i, 0))

    compiler_kwargs = dict(dimension_semantics=("parallel",))
    # 3 operands x 2 pipeline buffers per block; raise the scoped-VMEM limit only
    # when the v7x-sized blocks would exceed the 16 MiB v5e default comfort zone.
    block_footprint = 3 * 2 * block_rows * lanes * itemsize
    if block_footprint > (12 << 20):
        compiler_kwargs["vmem_limit_bytes"] = 32 << 20

    out = pl.pallas_call(
        _avg_merge_kernel,
        out_shape=jax.ShapeDtypeStruct((rows_total, lanes), dtype),
        grid=grid,
        in_specs=[spec, spec],
        out_specs=spec,
        compiler_params=pltpu.CompilerParams(**compiler_kwargs),
        cost_estimate=pl.CostEstimate(
            flops=2 * n, transcendentals=0, bytes_accessed=3 * n * itemsize
        ),
    )(a, b)

    if needs_pad:
        return out.reshape(-1)[:n].reshape(orig_shape)
    return out.reshape(orig_shape)


# --------------------------- pure-JAX reference ------------------------------
def ref_avg_pool_merge(x1, x2):
    # torch.stack((x1, x2), dim=1).mean(axis=1)
    return jnp.stack((x1, x2), axis=1).mean(axis=1)


if __name__ == "__main__":
    key = jax.random.PRNGKey(0)

    def _check(shape, dtype=jnp.float32, rtol=1e-6, atol=1e-6):
        k1, k2 = jax.random.split(jax.random.fold_in(key, hash(shape) & 0xFFFF))
        x1 = jax.random.normal(k1, shape, dtype)
        x2 = jax.random.normal(k2, shape, dtype)
        y = jax.block_until_ready(avg_pool_merge(x1, x2))
        y_ref = ref_avg_pool_merge(x1, x2)
        assert y.shape == x1.shape
        assert jnp.allclose(y, y_ref, rtol=rtol, atol=atol), f"mismatch for {shape}"

    # Primary small case consistent with the module's forward (two equal tensors).
    _check((2, 4, 16, 16))
    # Non-128-aligned size: exercises the (rare) padded path.
    _check((3, 5, 7))
    # Larger 128-aligned size: exercises the zero-copy multi-step grid path.
    _check((2, 64, 32, 32))

    print("KERNEL_OK")
</pallas_src>

<mosaic_0001>
module attributes {stable_mosaic.version = 11 : i64} {
  func.func @_avg_merge_kernel(%arg0: i32, %arg1: memref<2x1024xf32, #tpu.memory_space<vmem>>, %arg2: memref<2x1024xf32, #tpu.memory_space<vmem>>, %arg3: memref<2x1024xf32, #tpu.memory_space<vmem>>) attributes {dimension_semantics = [#tpu.dimension_semantics<parallel>], iteration_bounds = array<i64: 1>, scalar_prefetch = 0 : i64, scratch_operands = 0 : i64, tpu.core_type = #tpu.core_type<tc>, window_params = [{transform_indices = @transform_0, window_bounds = array<i64: 2, 1024>}, {transform_indices = @transform_1, window_bounds = array<i64: 2, 1024>}, {transform_indices = @transform_2, window_bounds = array<i64: 2, 1024>}]} {
    %c0 = arith.constant 0 : index
    %c0_0 = arith.constant 0 : index
    %0 = vector.load %arg1[%c0, %c0_0] : memref<2x1024xf32, #tpu.memory_space<vmem>>, vector<2x1024xf32>
    %c0_1 = arith.constant 0 : index
    %c0_2 = arith.constant 0 : index
    %1 = vector.load %arg2[%c0_1, %c0_2] : memref<2x1024xf32, #tpu.memory_space<vmem>>, vector<2x1024xf32>
    %2 = arith.addf %0, %1 : vector<2x1024xf32>
    %cst = arith.constant 5.000000e-01 : f32
    %3 = vector.broadcast %cst : f32 to vector<2x1024xf32>
    %4 = arith.mulf %2, %3 : vector<2x1024xf32>
    %c0_3 = arith.constant 0 : index
    %c0_4 = arith.constant 0 : index
    %5 = vector.load %arg3[%c0_3, %c0_4] : memref<2x1024xf32, #tpu.memory_space<vmem>>, vector<2x1024xf32>
    tpu.vector_store %arg3[%c0_3, %c0_4], %4 {strides = array<i32>} : memref<2x1024xf32, #tpu.memory_space<vmem>>, vector<2x1024xf32>,
    return
  }
  func.func @transform_0(%arg0: i32) -> (i32, i32) {
    %c0_i32 = arith.constant 0 : i32
    %c0_i32_0 = arith.constant 0 : i32
    return %arg0, %c0_i32 : i32, i32
  }
  func.func @transform_1(%arg0: i32) -> (i32, i32) {
    %c0_i32 = arith.constant 0 : i32
    %c0_i32_0 = arith.constant 0 : i32
    return %arg0, %c0_i32 : i32, i32
  }
  func.func @transform_2(%arg0: i32) -> (i32, i32) {
    %c0_i32 = arith.constant 0 : i32
    %c0_i32_0 = arith.constant 0 : i32
    return %arg0, %c0_i32 : i32, i32
  }
}

</mosaic_0001>

<bundles_post_ra>
// kernel: tpu_custom_call.1
= control target key start
LH: loop header
LB: loop body
LE: loop exit
PB: predicated region body
PF: predicated region fallthrough
CT: control target
= control target key end

     0   :  { %7 = vsyncpa [#allocation3], 0  ;;  %s176_s0 = inlined_call_operand.hbm [shape: f32[2,1024], index: 0, kind: input, shape index: {}]   ;;  %s177_s1 = inlined_call_operand.hbm [shape: f32[2,1024], index: 1, kind: input, shape index: {}]   ;;  %s178_s2 = inlined_call_operand.hbm [shape: f32[2,1024], index: 2, kind: output, shape index: {}]  }
   0x1   :  { %8 = vsyncpa [#allocation6], 0 }
   0x2   :  { %9 = vsyncpa [#allocation4], 0  ;;  %s15_s11 = sshll.u32 %s176_s0, 4  ;;  %s149_s12 = smov [#allocation2]   ;;  %s16_s11 = int_to_ptr.hbm [resolvable:$true] %s15_s11 }
   0x3   :  { %s17_s13 = sshll.u32 %s149_s12, 4  ;;  %s26_s16 = sshll.u32 %s177_s1, 4  ;;  %s18_s13 = int_to_ptr.vmem [resolvable:$true] %s17_s13  ;;  %s27_s16 = int_to_ptr.hbm [resolvable:$true] %s26_s16 }
   0x4   :  { %20 = dma.hbm_to_vmem [thread:$0]  %s16_s11, 256, %s18_s13, [#allocation3]  }
   0x5   :  { %s150_s17 = smov [#allocation5]  }
   0x6   :  { %s28_s18 = sshll.u32 %s150_s17, 4  ;;  %s29_s18 = int_to_ptr.vmem [resolvable:$true] %s28_s18 }
   0x7   :  { %31 = dma.hbm_to_vmem [thread:$0]  %s27_s16, 256, %s29_s18, [#allocation6]  }
   0x8   :  { %143 = dma.done.wait [#allocation3], 256  }
   0x9   :  { %144 = vsyncadd [#allocation3], 4294967040 }
   0xa   :  { %145 = dma.done.wait [#allocation6], 256  }
   0xb   :  { %146 = vsyncadd [#allocation6], 4294967040  ;;  %v40_v0 = vld [vmem:[#allocation2] sm:$0xff]  ;;  %v42_v1 = vld [vmem:[#allocation5] sm:$0xff]  ;;  %s151_s0 = smov [#allocation7]   ;;  %s57_s1 = sshll.u32 %s178_s2, 4  ;;  %s58_s1 = int_to_ptr.hbm [resolvable:$true] %s57_s1 }
   0xc   :  { %v41_v2 = vld [vmem:[#allocation2 + $0x8] sm:$0xff]  ;;  %v44_v3 = vadd.f32 %v42_v1, %v40_v0  ;;  %v43_v4 = vld [vmem:[#allocation5 + $0x8] sm:$0xff]  ;;  %s55_s19 = sshll.u32 %s151_s0, 4  ;;  %s56_s19 = int_to_ptr.vmem [resolvable:$true] %s55_s19 }
   0xd   :  { %v45_v5 = vadd.f32 %v43_v4, %v41_v2 }
   0xe   :  { %v46_v6 = vmul.f32 0.5, %v44_v3 }
   0xf   :  { %v47_v7 = vmul.f32 0.5, %v45_v5 }
  0x10   :  { %48 = vst [vmem:[#allocation7] sm:$0xff] %v46_v6 }
  0x11   :  { %49 = vst [vmem:[#allocation7 + $0x8] sm:$0xff] %v47_v7 }
  0x12   :  { %60 = dma.vmem_to_hbm [thread:$0]  %s56_s19, 256, %s58_s1, [#allocation4]  }
  0x13   :  { %147 = dma.done.wait [#allocation4], 256  }
  0x14   :  { %148 = vsyncadd [#allocation4], 4294967040 }
  0x15   :  { %65 = vsyncpa [#allocation3], 1 }
  0x16   :  { %66 = vsyncpa [#allocation6], 1 }
  0x17   :  { %67 = vsyncpa [#allocation4], 1 }

</bundles_post_ra>
